<compile_context>
chip_gen: v7x
topology: tpu7x:2x2x1
jax: 0.10.0
libtpu: 0.0.40
codegen_flags: <defaults>
</compile_context>

<pallas_src>
import jax
import jax.numpy as jnp
from jax.experimental import pallas as pl
from jax.experimental.pallas import tpu as pltpu


_TARGET_TILE_BYTES = 4 * 1024 * 1024   # ~4 MiB input tile -> ~16 MiB pipelined (in+out, 2x buffered)
_VMEM_LIMIT_BYTES = 32 * 1024 * 1024   # explicit limit: covers v5e's 16 MiB scoped default
_LANE_CANDIDATES = (1024, 512, 256, 128)


def _identity_kernel(x_ref, o_ref):
    # Pure pass-through: load the VMEM tile and store it back out.
    o_ref[...] = x_ref[...]


def _sublane_multiple(dtype):
    # 32-bit rows align to 8 sublanes; bf16 packs 2/row -> 16; int8/fp8 -> 32.
    itemsize = jnp.dtype(dtype).itemsize
    return max(8, 8 * (4 // max(1, itemsize)))


def _identity_copy_2d(x2d):
    """Lane-dense, tiled identity copy of a 2D array via a Pallas kernel."""
    rows, lanes = x2d.shape
    itemsize = jnp.dtype(x2d.dtype).itemsize
    align = _sublane_multiple(x2d.dtype)

    # Rows per tile from a ~4 MiB byte budget (amortizes ~0.35 us/step overhead
    # even on v7x's 3.2 TB/s HBM, while in+out double-buffered stays <= 16 MiB).
    rows_budget = max(1, _TARGET_TILE_BYTES // max(1, lanes * itemsize))

    # Guarantee at least 2 (preferably 4) grid steps when the array is big enough,
    # so "parallel" semantics can shard work across v7x's two TensorCores.
    if rows >= 4 * align:
        min_steps = 4
    elif rows >= 2 * align:
        min_steps = 2
    else:
        min_steps = 1

    if min_steps == 1:
        # Too small to split into aligned tiles: one full-extent block (always legal).
        rows_per_tile = rows
    else:
        rows_per_tile = min(rows_budget, rows, pl.cdiv(rows, min_steps))
        # Sublane/packing-aligned tile; the ragged last block is masked by Pallas.
        rows_per_tile = max(align, (rows_per_tile // align) * align)

    grid = (pl.cdiv(rows, rows_per_tile),)

    return pl.pallas_call(
        _identity_kernel,
        out_shape=jax.ShapeDtypeStruct((rows, lanes), x2d.dtype),
        grid_spec=pltpu.PrefetchScalarGridSpec(
            num_scalar_prefetch=0,
            grid=grid,
            in_specs=[pl.BlockSpec((rows_per_tile, lanes), lambda i: (i, 0))],
            out_specs=pl.BlockSpec((rows_per_tile, lanes), lambda i: (i, 0)),
        ),
        compiler_params=pltpu.CompilerParams(
            dimension_semantics=("parallel",),
            vmem_limit_bytes=_VMEM_LIMIT_BYTES,
        ),
    )(x2d)


def _pallas_identity(obs):
    """Identity of obs computed through the Pallas copy kernel (lane-dense view)."""
    orig_shape = obs.shape
    total = obs.size

    # Pick the largest lane width (multiple of 128) that divides the flat size.
    lanes = None
    for cand in _LANE_CANDIDATES:
        if total % cand == 0:
            lanes = cand
            break

    flat = obs.reshape(total)
    padded = False
    if lanes is None:
        # Lane-dense fallback: pad the flat view up to a 128-multiple and slice
        # the pad off afterwards (never put a narrow axis like W=16 on lanes).
        lanes = 128
        padded_total = pl.cdiv(total, lanes) * lanes
        flat = jnp.pad(flat, (0, padded_total - total))
        padded = True

    x2d = flat.reshape(flat.size // lanes, lanes)
    out2d = _identity_copy_2d(x2d)

    out_flat = out2d.reshape(-1)
    if padded:
        out_flat = out_flat[:total]
    return out_flat.reshape(orig_shape)


def rl_representation_forward(obs, detach=False, run_kernel=False):
    """Forward pass of the (abstract) RLRepresentation base module.

    obs: jnp.ndarray, e.g. [N, C, H, W] (NCHW, matching PyTorch).
    detach: no-op for forward values (stop_gradient applied for parity).
    run_kernel: by default the identity is returned with ZERO data movement
        (launching a memcpy kernel for an identity op is pure HBM waste); set
        run_kernel=True to route through the Pallas copy kernel (testing/demo).
    """
    out = _pallas_identity(obs) if run_kernel else obs
    if detach:
        out = jax.lax.stop_gradient(out)
    return out


if __name__ == "__main__":
    key = jax.random.PRNGKey(0)
    # Small shapes consistent with an image observation: batch=2, channels=4, 16x16.
    obs = jax.random.normal(key, (2, 4, 16, 16), dtype=jnp.float32)

    # Recommended fast path: identity with no kernel launch.
    fast = rl_representation_forward(obs, detach=False)

    # Kernel path: exercise the Pallas identity copy once on-device.
    out = rl_representation_forward(obs, detach=True, run_kernel=True)
    out = jax.block_until_ready(out)

    # Identity semantics check (the base forward defines no transform).
    assert out.shape == obs.shape
    assert out.dtype == obs.dtype
    assert bool(jnp.allclose(out, obs))
    assert bool(jnp.allclose(fast, obs))

    print("KERNEL_OK")
</pallas_src>

<mosaic_0001>
module attributes {stable_mosaic.version = 11 : i64} {
  func.func @_identity_kernel(%arg0: i32, %arg1: memref<2x1024xf32, #tpu.memory_space<vmem>>, %arg2: memref<2x1024xf32, #tpu.memory_space<vmem>>) attributes {dimension_semantics = [#tpu.dimension_semantics<parallel>], iteration_bounds = array<i64: 1>, scalar_prefetch = 0 : i64, scratch_operands = 0 : i64, tpu.core_type = #tpu.core_type<tc>, window_params = [{transform_indices = @transform_0, window_bounds = array<i64: 2, 1024>}, {transform_indices = @transform_1, window_bounds = array<i64: 2, 1024>}]} {
    %c0 = arith.constant 0 : index
    %c0_0 = arith.constant 0 : index
    %0 = vector.load %arg1[%c0, %c0_0] : memref<2x1024xf32, #tpu.memory_space<vmem>>, vector<2x1024xf32>
    %c0_1 = arith.constant 0 : index
    %c0_2 = arith.constant 0 : index
    %1 = vector.load %arg2[%c0_1, %c0_2] : memref<2x1024xf32, #tpu.memory_space<vmem>>, vector<2x1024xf32>
    tpu.vector_store %arg2[%c0_1, %c0_2], %0 {strides = array<i32>} : memref<2x1024xf32, #tpu.memory_space<vmem>>, vector<2x1024xf32>,
    return
  }
  func.func @transform_0(%arg0: i32) -> (i32, i32) {
    %c0_i32 = arith.constant 0 : i32
    %c0_i32_0 = arith.constant 0 : i32
    return %arg0, %c0_i32 : i32, i32
  }
  func.func @transform_1(%arg0: i32) -> (i32, i32) {
    %c0_i32 = arith.constant 0 : i32
    %c0_i32_0 = arith.constant 0 : i32
    return %arg0, %c0_i32 : i32, i32
  }
}

</mosaic_0001>

<bundles_post_ra>
// kernel: tpu_custom_call.1
= control target key start
LH: loop header
LB: loop body
LE: loop exit
PB: predicated region body
PF: predicated region fallthrough
CT: control target
= control target key end

     0   :  { %6 = vsyncpa [#allocation3], 0  ;;  %s126_s0 = inlined_call_operand.hbm [shape: f32[2,1024], index: 0, kind: input, shape index: {}]   ;;  %s127_s1 = inlined_call_operand.hbm [shape: f32[2,1024], index: 1, kind: output, shape index: {}]  }
   0x1   :  { %7 = vsyncpa [#allocation4], 0  ;;  %s90_s6 = smov [#allocation2]   ;;  %s42_s10 = scalar_lea.hbm %s126_s0, 256 }
   0x2   :  { %s14_s7 = sshll.u32 %s90_s6, 4  ;;  %p43_p0 = scmp.ne.s32.totalorder %s126_s0, %s42_s10  ;;  %s15_s7 = int_to_ptr.vmem [resolvable:$true] %s14_s7 }
   0x3   :  { %p46_p1 = scmp.lt.u32.totalorder %s42_s10, %s126_s0 }
   0x5   :  { %p48_p2 = pnand %p46_p1, %p43_p0 }
   0x7   :  { %51 = shalt.err (!%p48_p2)
}
   0x8   :  { %s52_s15 = scalar_lea.vmem %s15_s7, 256  ;;  %p57_p4 = scmp.lt.s32.totalorder %s15_s7, %s15_s7 }
   0x9   :  { %p53_p3 = scmp.ne.s32.totalorder %s15_s7, %s52_s15  ;;  %p58_p5 = scmp.lt.s32.totalorder %s52_s15, %s52_s15 }
   0xb   :  { %p59_p6 = por %p58_p5, %p57_p4 }
   0xd   :  { %p60_p7 = pnand %p59_p6, %p53_p3 }
   0xf   :  { %63 = shalt.err (!%p60_p7)
}
  0x10   :  { %17 = dma.hbm_to_vmem [thread:$0]  %s126_s0, 256, %s15_s7, [#allocation3]  }
  0x11   :  { %86 = dma.done.wait [#allocation3], 256  }
  0x12   :  { %87 = vsyncadd [#allocation3], 4294967040  ;;  %s91_s18 = smov [#allocation5]   ;;  %v21_v0 = vld [vmem:[#allocation2] sm:$0xff]  ;;  %v22_v1 = vld [vmem:[#allocation2 + $0x8] sm:$0xff] }
  0x13   :  { %s31_s19 = sshll.u32 %s91_s18, 4  ;;  %23 = vst [vmem:[#allocation5] sm:$0xff] %v21_v0  ;;  %24 = vst [vmem:[#allocation5 + $0x8] sm:$0xff] %v22_v1  ;;  %s32_s19 = int_to_ptr.vmem [resolvable:$true] %s31_s19 }
  0x14   :  { %s64_s20 = scalar_lea.vmem %s32_s19, 256  ;;  %p69_p9 = scmp.lt.s32.totalorder %s32_s19, %s32_s19 }
  0x15   :  { %p65_p8 = scmp.ne.s32.totalorder %s32_s19, %s64_s20  ;;  %p70_p10 = scmp.lt.s32.totalorder %s64_s20, %s64_s20 }
  0x17   :  { %p71_p11 = por %p70_p10, %p69_p9 }
  0x19   :  { %p72_p12 = pnand %p71_p11, %p65_p8 }
  0x1b   :  { %75 = shalt.err (!%p72_p12)
}
  0x1c   :  { %s76_s0 = scalar_lea.hbm %s127_s1, 256 }
  0x1d   :  { %p77_p13 = scmp.ne.s32.totalorder %s127_s1, %s76_s0  ;;  %p80_p0 = scmp.lt.u32.totalorder %s76_s0, %s127_s1 }
  0x1f   :  { %p82_p1 = pnand %p80_p0, %p77_p13 }
  0x21   :  { %85 = shalt.err (!%p82_p1)
}
  0x22   :  { %34 = dma.vmem_to_hbm [thread:$0]  %s32_s19, 256, %s127_s1, [#allocation4]  }
  0x23   :  { %88 = dma.done.wait [#allocation4], 256  }
  0x24   :  { %89 = vsyncadd [#allocation4], 4294967040 }
  0x25   :  { %38 = vsyncpa [#allocation3], 1 }
  0x26   :  { %39 = vsyncpa [#allocation4], 1 }

</bundles_post_ra>
